<compile_context>
chip_gen: v7x
topology: tpu7x:2x2x1
jax: 0.10.0
libtpu: 0.0.40
codegen_flags: <defaults>
</compile_context>

<pallas_src>
import jax
import jax.numpy as jnp
from jax import lax
from jax.experimental import pallas as pl
from jax.experimental.pallas import tpu as pltpu


B_TILE = 8  # bags per grid step (sublane granularity)


def _round_up(x, m):
    return (x + m - 1) // m * m


def embedding_bag_fc_kernel(text_ref, starts_ref, ends_ref,
                            emb_ref, w_ref, bias_ref, out_ref):
    """EmbeddingBag(mode='mean') + Linear for one B-tile, fully vectorized.

    text_ref   : VMEM [T_pad, 1]  int32 token ids (-1 for padding rows)
    starts_ref : VMEM [B_t, 1]    int32 bag start positions
    ends_ref   : VMEM [B_t, 1]    int32 bag end positions (start==end => empty)
    emb_ref    : VMEM [V_pad, D_pad] f32 embedding table (zero-padded)
    w_ref      : VMEM [D_pad, C_pad] f32 (transposed, zero-padded fc.weight)
    bias_ref   : VMEM [1, C_pad]     f32
    out_ref    : VMEM [B_t, C_pad]   f32
    """
    T_pad = text_ref.shape[0]
    B_t = starts_ref.shape[0]
    V_pad = emb_ref.shape[0]

    # One-hot token matrix [T_pad, V_pad] (exact 0/1 -> bf16 is lossless).
    # Padded (-1) and out-of-range ids match no column -> all-zero row.
    v_iota = lax.broadcasted_iota(jnp.int32, (T_pad, V_pad), 1)
    onehot = (text_ref[...] == v_iota).astype(jnp.bfloat16)         # [T_pad, V_pad]

    # Bag membership indicator [B_t, T_pad] (exact 0/1, no 1/count baked in).
    t_iota = lax.broadcasted_iota(jnp.int32, (B_t, T_pad), 1)
    starts = starts_ref[...]                                          # [B_t, 1]
    ends = ends_ref[...]                                              # [B_t, 1]
    in_bag = ((t_iota >= starts) & (t_iota < ends)).astype(jnp.bfloat16)

    # Reassociated chain: (in_bag @ onehot) @ emb.
    # bag_hist[b, v] = exact integer count of token v in bag b (f32 accumulate).
    bag_hist = jnp.dot(in_bag, onehot,
                       preferred_element_type=jnp.float32)            # [B_t, V_pad]
    bag_sum = jnp.dot(bag_hist, emb_ref[...],
                      preferred_element_type=jnp.float32)              # [B_t, D_pad]

    # Sum-then-scale mean (matches PyTorch EmbeddingBag(mean)); empty bag -> 0.
    counts = jnp.maximum(ends - starts, 1).astype(jnp.float32)         # [B_t, 1]
    bag_mean = bag_sum * (1.0 / counts)                                # VPU scale

    out_ref[...] = (
        jnp.dot(bag_mean, w_ref[...], preferred_element_type=jnp.float32)
        + bias_ref[...]
    )


def init_padded_params(emb_table, fc_w, fc_b):
    """Pad parameters to (8,128)-friendly shapes ONCE (not per forward call)."""
    V, D = emb_table.shape
    C = fc_w.shape[0]
    V_pad = _round_up(V, 128)
    D_pad = _round_up(D, 128)
    C_pad = _round_up(C, 128)

    emb_p = jnp.zeros((V_pad, D_pad), jnp.float32).at[:V, :D].set(emb_table)
    w_p = jnp.zeros((D_pad, C_pad), jnp.float32).at[:D, :C].set(fc_w.T)
    b_p = jnp.zeros((1, C_pad), jnp.float32).at[0, :C].set(fc_b)
    return {"emb_p": emb_p, "w_p": w_p, "b_p": b_p,
            "vocab_size": V, "embed_dim": D, "num_class": C}


def text_classification_forward(text, offsets, params):
    emb_p, w_p, b_p = params["emb_p"], params["w_p"], params["b_p"]
    num_class = params["num_class"]
    V_pad, D_pad = emb_p.shape
    C_pad = w_p.shape[1]

    T = text.shape[0]
    B = offsets.shape[0]
    T_pad = _round_up(max(T, 1), 128)
    B_pad = _round_up(max(B, 1), B_TILE)

    # Token ids as a column; padding rows get -1 (never matches the one-hot).
    text_col = jnp.full((T_pad, 1), -1, jnp.int32).at[:T, 0].set(
        text.astype(jnp.int32))

    # Bag b covers [offsets[b], offsets[b+1]); last bag ends at T.
    starts = offsets.astype(jnp.int32)
    ends = jnp.concatenate([starts[1:], jnp.array([T], jnp.int32)])
    # Padded bags: start == end == T -> empty -> zero output row.
    starts_col = jnp.full((B_pad, 1), T, jnp.int32).at[:B, 0].set(starts)
    ends_col = jnp.full((B_pad, 1), T, jnp.int32).at[:B, 0].set(ends)

    grid = (B_pad // B_TILE,)

    grid_spec = pltpu.PrefetchScalarGridSpec(
        num_scalar_prefetch=0,
        grid=grid,
        in_specs=[
            pl.BlockSpec((T_pad, 1), lambda i: (0, 0)),      # text (shared)
            pl.BlockSpec((B_TILE, 1), lambda i: (i, 0)),     # starts (per B-tile)
            pl.BlockSpec((B_TILE, 1), lambda i: (i, 0)),     # ends   (per B-tile)
            pl.BlockSpec((V_pad, D_pad), lambda i: (0, 0)),  # embedding table
            pl.BlockSpec((D_pad, C_pad), lambda i: (0, 0)),  # fc weight (transposed)
            pl.BlockSpec((1, C_pad), lambda i: (0, 0)),      # fc bias
        ],
        out_specs=pl.BlockSpec((B_TILE, C_pad), lambda i: (i, 0)),
    )

    out = pl.pallas_call(
        embedding_bag_fc_kernel,
        out_shape=jax.ShapeDtypeStruct((B_pad, C_pad), jnp.float32),
        grid_spec=grid_spec,
        compiler_params=pltpu.CompilerParams(
            # B-tiles are independent -> shard across v7x's two TensorCores.
            dimension_semantics=("parallel",)),
    )(text_col, starts_col, ends_col, emb_p, w_p, b_p)

    return out[:B, :num_class]


def ref_forward(text, offsets, emb_table, fc_w_t, fc_b):
    """Pure-JAX reference matching PyTorch EmbeddingBag(mean) + Linear."""
    T = text.shape[0]
    B = offsets.shape[0]
    ends = jnp.concatenate([offsets[1:], jnp.array([T], offsets.dtype)])
    rows = []
    for b in range(B):
        s, e = int(offsets[b]), int(ends[b])
        if e > s:
            rows.append(emb_table[text[s:e]].sum(axis=0) / (e - s))
        else:
            rows.append(jnp.zeros((emb_table.shape[1],), jnp.float32))
    emb = jnp.stack(rows)
    return emb @ fc_w_t + fc_b


if __name__ == "__main__":
    vocab_size, embed_dim, num_class = 32, 32, 4
    T, B = 8, 4  # 8 flat tokens, 4 bags

    key = jax.random.PRNGKey(0)
    k_emb, k_fc, k_text = jax.random.split(key, 3)

    initrange = 0.5
    # nn.EmbeddingBag weight: [vocab_size, embed_dim], uniform(-0.5, 0.5)
    emb_table = jax.random.uniform(
        k_emb, (vocab_size, embed_dim), jnp.float32, -initrange, initrange)
    # nn.Linear weight: [num_class, embed_dim], uniform(-0.5, 0.5); bias zeros
    fc_w = jax.random.uniform(
        k_fc, (num_class, embed_dim), jnp.float32, -initrange, initrange)
    fc_b = jnp.zeros((num_class,), jnp.float32)

    # Pad parameters once, outside the forward path.
    params = init_padded_params(emb_table, fc_w, fc_b)

    text = jax.random.randint(k_text, (T,), 0, vocab_size, jnp.int32)
    offsets = jnp.array([0, 2, 5, 6], dtype=jnp.int32)  # bag starts

    out = text_classification_forward(text, offsets, params)
    out = jax.block_until_ready(out)

    ref = ref_forward(text, offsets, emb_table, fc_w.T, fc_b)
    assert out.shape == (B, num_class)
    assert jnp.allclose(out, ref, atol=1e-5, rtol=1e-5), (out, ref)

    print("KERNEL_OK")
</pallas_src>

<mosaic_0001>
module attributes {stable_mosaic.version = 11 : i64} {
  func.func @embedding_bag_fc_kernel(%arg0: i32, %arg1: memref<128x1xi32, #tpu.memory_space<vmem>>, %arg2: memref<8x1xi32, #tpu.memory_space<vmem>>, %arg3: memref<8x1xi32, #tpu.memory_space<vmem>>, %arg4: memref<128x128xf32, #tpu.memory_space<vmem>>, %arg5: memref<128x128xf32, #tpu.memory_space<vmem>>, %arg6: memref<1x128xf32, #tpu.memory_space<vmem>>, %arg7: memref<8x128xf32, #tpu.memory_space<vmem>>) attributes {dimension_semantics = [#tpu.dimension_semantics<parallel>], iteration_bounds = array<i64: 1>, scalar_prefetch = 0 : i64, scratch_operands = 0 : i64, tpu.core_type = #tpu.core_type<tc>, window_params = [{pipeline_mode = #tpu.pipeline_mode<synchronous>, transform_indices = @transform_0, window_bounds = array<i64: 128, 1>}, {transform_indices = @transform_1, window_bounds = array<i64: 8, 1>}, {transform_indices = @transform_2, window_bounds = array<i64: 8, 1>}, {pipeline_mode = #tpu.pipeline_mode<synchronous>, transform_indices = @transform_3, window_bounds = array<i64: 128, 128>}, {pipeline_mode = #tpu.pipeline_mode<synchronous>, transform_indices = @transform_4, window_bounds = array<i64: 128, 128>}, {pipeline_mode = #tpu.pipeline_mode<synchronous>, transform_indices = @transform_5, window_bounds = array<i64: 1, 128>}, {transform_indices = @transform_6, window_bounds = array<i64: 8, 128>}]} {
    %0 = tpu.iota {dimensions = array<i32: 1>} : vector<128x128xi32>
    %c0 = arith.constant 0 : index
    %c0_0 = arith.constant 0 : index
    %1 = vector.load %arg1[%c0, %c0_0] : memref<128x1xi32, #tpu.memory_space<vmem>>, vector<128x1xi32>
    %2 = vector.broadcast %1 : vector<128x1xi32> to vector<128x128xi32>
    %3 = arith.cmpi eq, %2, %0 : vector<128x128xi32>
    %4 = arith.extui %3 : vector<128x128xi1> to vector<128x128xi32>
    %5 = arith.sitofp %4 : vector<128x128xi32> to vector<128x128xf32>
    %6 = arith.truncf %5 : vector<128x128xf32> to vector<128x128xbf16>
    %7 = tpu.iota {dimensions = array<i32: 1>} : vector<8x128xi32>
    %c0_1 = arith.constant 0 : index
    %c0_2 = arith.constant 0 : index
    %8 = vector.load %arg2[%c0_1, %c0_2] : memref<8x1xi32, #tpu.memory_space<vmem>>, vector<8x1xi32>
    %c0_3 = arith.constant 0 : index
    %c0_4 = arith.constant 0 : index
    %9 = vector.load %arg3[%c0_3, %c0_4] : memref<8x1xi32, #tpu.memory_space<vmem>>, vector<8x1xi32>
    %10 = vector.broadcast %8 : vector<8x1xi32> to vector<8x128xi32>
    %11 = arith.cmpi sge, %7, %10 : vector<8x128xi32>
    %12 = vector.broadcast %9 : vector<8x1xi32> to vector<8x128xi32>
    %13 = arith.cmpi slt, %7, %12 : vector<8x128xi32>
    %14 = arith.andi %11, %13 : vector<8x128xi1>
    %15 = arith.extui %14 : vector<8x128xi1> to vector<8x128xi32>
    %16 = arith.sitofp %15 : vector<8x128xi32> to vector<8x128xf32>
    %17 = arith.truncf %16 : vector<8x128xf32> to vector<8x128xbf16>
    %cst = arith.constant dense<0.000000e+00> : vector<8x128xf32>
    %18 = tpu.matmul %17, %6, %cst {dimension_numbers = #tpu.dot_dimension_numbers<[1], [0], [0], [1], [0, 0, 1, 1], [], []>} : vector<8x128xbf16>, vector<128x128xbf16>, vector<8x128xf32> -> vector<8x128xf32>
    %c0_5 = arith.constant 0 : index
    %c0_6 = arith.constant 0 : index
    %19 = vector.load %arg4[%c0_5, %c0_6] : memref<128x128xf32, #tpu.memory_space<vmem>>, vector<128x128xf32>
    %cst_7 = arith.constant dense<0.000000e+00> : vector<8x128xf32>
    %20 = tpu.matmul %18, %19, %cst_7 {dimension_numbers = #tpu.dot_dimension_numbers<[1], [0], [0], [1], [0, 0, 1, 1], [], []>} : vector<8x128xf32>, vector<128x128xf32>, vector<8x128xf32> -> vector<8x128xf32>
    %21 = arith.subi %9, %8 : vector<8x1xi32>
    %c1_i32 = arith.constant 1 : i32
    %22 = vector.broadcast %c1_i32 : i32 to vector<8x1xi32>
    %23 = arith.maxsi %21, %22 : vector<8x1xi32>
    %24 = arith.sitofp %23 : vector<8x1xi32> to vector<8x1xf32>
    %cst_8 = arith.constant 1.000000e+00 : f32
    %25 = vector.broadcast %cst_8 : f32 to vector<8x1xf32>
    %26 = arith.divf %25, %24 : vector<8x1xf32>
    %27 = vector.broadcast %26 : vector<8x1xf32> to vector<8x128xf32>
    %28 = arith.mulf %20, %27 : vector<8x128xf32>
    %c0_9 = arith.constant 0 : index
    %c0_10 = arith.constant 0 : index
    %29 = vector.load %arg5[%c0_9, %c0_10] : memref<128x128xf32, #tpu.memory_space<vmem>>, vector<128x128xf32>
    %cst_11 = arith.constant dense<0.000000e+00> : vector<8x128xf32>
    %30 = tpu.matmul %28, %29, %cst_11 {dimension_numbers = #tpu.dot_dimension_numbers<[1], [0], [0], [1], [0, 0, 1, 1], [], []>} : vector<8x128xf32>, vector<128x128xf32>, vector<8x128xf32> -> vector<8x128xf32>
    %c0_12 = arith.constant 0 : index
    %c0_13 = arith.constant 0 : index
    %31 = vector.load %arg6[%c0_12, %c0_13] : memref<1x128xf32, #tpu.memory_space<vmem>>, vector<1x128xf32>
    %32 = vector.broadcast %31 : vector<1x128xf32> to vector<8x128xf32>
    %33 = arith.addf %30, %32 : vector<8x128xf32>
    %c0_14 = arith.constant 0 : index
    %c0_15 = arith.constant 0 : index
    %34 = vector.load %arg7[%c0_14, %c0_15] : memref<8x128xf32, #tpu.memory_space<vmem>>, vector<8x128xf32>
    tpu.vector_store %arg7[%c0_14, %c0_15], %33 {strides = array<i32>} : memref<8x128xf32, #tpu.memory_space<vmem>>, vector<8x128xf32>,
    return
  }
  func.func @transform_0(%arg0: i32) -> (i32, i32) {
    %c0_i32 = arith.constant 0 : i32
    %c0_i32_0 = arith.constant 0 : i32
    %c0_i32_1 = arith.constant 0 : i32
    return %c0_i32, %c0_i32_0 : i32, i32
  }
  func.func @transform_1(%arg0: i32) -> (i32, i32) {
    %c0_i32 = arith.constant 0 : i32
    %c0_i32_0 = arith.constant 0 : i32
    return %arg0, %c0_i32 : i32, i32
  }
  func.func @transform_2(%arg0: i32) -> (i32, i32) {
    %c0_i32 = arith.constant 0 : i32
    %c0_i32_0 = arith.constant 0 : i32
    return %arg0, %c0_i32 : i32, i32
  }
  func.func @transform_3(%arg0: i32) -> (i32, i32) {
    %c0_i32 = arith.constant 0 : i32
    %c0_i32_0 = arith.constant 0 : i32
    %c0_i32_1 = arith.constant 0 : i32
    return %c0_i32, %c0_i32_0 : i32, i32
  }
  func.func @transform_4(%arg0: i32) -> (i32, i32) {
    %c0_i32 = arith.constant 0 : i32
    %c0_i32_0 = arith.constant 0 : i32
    %c0_i32_1 = arith.constant 0 : i32
    return %c0_i32, %c0_i32_0 : i32, i32
  }
  func.func @transform_5(%arg0: i32) -> (i32, i32) {
    %c0_i32 = arith.constant 0 : i32
    %c0_i32_0 = arith.constant 0 : i32
    %c0_i32_1 = arith.constant 0 : i32
    return %c0_i32, %c0_i32_0 : i32, i32
  }
  func.func @transform_6(%arg0: i32) -> (i32, i32) {
    %c0_i32 = arith.constant 0 : i32
    %c0_i32_0 = arith.constant 0 : i32
    return %arg0, %c0_i32 : i32, i32
  }
}

</mosaic_0001>

<bundles_post_ra>
// kernel: tpu_custom_call.1
= control target key start
LH: loop header
LB: loop body
LE: loop exit
PB: predicated region body
PF: predicated region fallthrough
CT: control target
= control target key end

     0   :  { %11 = vsyncpa [#allocation3], 0  ;;  %s903_s0 = inlined_call_operand.vmem [shape: s32[128,1], index: 0, kind: input, shape index: {}]   ;;  %s904_s1 = inlined_call_operand.vmem [shape: s32[8,1], index: 1, kind: input, shape index: {}]   ;;  %s905_s2 = inlined_call_operand.vmem [shape: s32[8,1], index: 2, kind: input, shape index: {}]   ;;  %s906_s3 = inlined_call_operand.vmem [shape: f32[128,128], index: 3, kind: input, shape index: {}]   ;;  %s907_s4 = inlined_call_operand.hbm [shape: f32[128,128], index: 4, kind: input, shape index: {}]   ;;  %s908_s5 = inlined_call_operand.vmem [shape: f32[1,128], index: 5, kind: input, shape index: {}]   ;;  %s909_s6 = inlined_call_operand.hbm [shape: f32[8,128], index: 6, kind: output, shape index: {}]  }
   0x1   :  { %12 = vsyncpa [#allocation4], 0  ;;  %s700_s21 = smov [#allocation2]   ;;  %s652_s25 = scalar_lea.hbm %s907_s4, 2048 }
   0x2   :  { %s26_s22 = sshll.u32 %s700_s21, 4  ;;  %p653_p0 = scmp.ne.s32.totalorder %s907_s4, %s652_s25  ;;  %s27_s22 = int_to_ptr.vmem [resolvable:$true] %s26_s22 }
   0x3   :  { %p656_p1 = scmp.lt.u32.totalorder %s652_s25, %s907_s4 }
   0x5   :  { %p658_p2 = pnand %p656_p1, %p653_p0 }
   0x7   :  { %661 = shalt.err (!%p658_p2)
}
   0x8   :  { %s662_s30 = scalar_lea.vmem %s27_s22, 2048  ;;  %p667_p4 = scmp.lt.s32.totalorder %s27_s22, %s27_s22 }
   0x9   :  { %p663_p3 = scmp.ne.s32.totalorder %s27_s22, %s662_s30  ;;  %p668_p5 = scmp.lt.s32.totalorder %s662_s30, %s662_s30 }
   0xb   :  { %p669_p6 = por %p668_p5, %p667_p4 }
   0xd   :  { %p670_p7 = pnand %p669_p6, %p663_p3 }
   0xf   :  { %673 = shalt.err (!%p670_p7)
}
  0x10   :  { %s701_s7 = smov 128   ;;  %s702_s8 = smov 8  }
  0x11   :  { %32 = dma.hbm_to_vmem [thread:$0]  %s907_s4, 2048, %s27_s22, [#allocation3], %s701_s7, %s701_s7, %s702_s8  }
  0x12   :  { %696 = dma.done.wait [#allocation3], 2048  }
  0x13   :  { %697 = vsyncadd [#allocation3], 4294965248  ;;  %v703_v0 = vmov 0   ;;  %v43_v1 = vld [vmem:[%s903_s0 + $0x10] sm:$0xff]  ;;  %v41_v2 = vld [vmem:[%s903_s0] sm:$0xff]  ;;  %v704_v9 = vmov 0.0   ;;  %v39_v49 = vlaneseq }
  0x14   :  { %649 = vset.pattern.permute.xlu1 %v703_v0  ;;  %648 = vset.pattern.permute.xlu0 %v703_v0  ;;  %v44_v3 = vld [vmem:[%s903_s0 + $0x18] sm:$0xff]  ;;  %v42_v4 = vld [vmem:[%s903_s0 + $0x8] sm:$0xff]  ;;  %v45_v6 = vld [vmem:[%s903_s0 + $0x20] sm:$0xff]  ;;  %vm705_vm1 = vmmov 0   ;;  %v706_v27 = vmov 0.0|0.0   ;;  %s708_s23 = smov [#allocation5]  }
  0x15   :  { %64 = vperm.xlu1 %649, %v43_v1   ;;  %58 = vperm.xlu0 %648, %v41_v2   ;;  %v46_v5 = vld [vmem:[%s903_s0 + $0x28] sm:$0xff]  ;;  %v162_v7 = vld [vmem:[%s905_s2] sm:$0xff]  ;;  %v48_v10 = vld [vmem:[%s903_s0 + $0x38] sm:$0xff]  ;;  %v40_v52 = vand.u32 127, %v39_v49  ;;  %v707_v55 = vmov 1.0|1.0  }
  0x16   :  { %v161_v8 = vld [vmem:[%s904_s1] sm:$0xff]  ;;  %501 = vmatprep.subr.bf16.mxu0 %v704_v9  ;;  %v47_v11 = vld [vmem:[%s903_s0 + $0x30] sm:$0xff]  ;;  %v50_v13 = vld [vmem:[%s903_s0 + $0x48] sm:$0xff]  ;;  %517 = vmatprep.mubr.msk.bf16.mxu0 %vm705_vm1, %v704_v9  ;;  %s413_s24 = sshll.u32 %s708_s23, 4  ;;  %s414_s24 = int_to_ptr.vmem [resolvable:$true] %s413_s24 }
  0x17   :  { %v301_v12 = vsub.s32 %v162_v7, %v161_v8  ;;  %v49_v14 = vld [vmem:[%s903_s0 + $0x40] sm:$0xff]  ;;  %v52_v16 = vld [vmem:[%s903_s0 + $0x58] sm:$0xff]  ;;  %v51_v17 = vld [vmem:[%s903_s0 + $0x50] sm:$0xff]  ;;  %553 = vmatprep.mubr.msk.f32.mxu1 %vm705_vm1, %v704_v9  ;;  %591 = vmatprep.subr.bf16.mxu1 %v706_v27  ;;  %s674_s25 = scalar_lea.vmem %s414_s24, 128  ;;  %p679_p9 = scmp.lt.s32.totalorder %s414_s24, %s414_s24 }
  0x18   :  { %v54_v19 = vld [vmem:[%s903_s0 + $0x68] sm:$0xff]  ;;  %v53_v20 = vld [vmem:[%s903_s0 + $0x60] sm:$0xff]  ;;  %v56_v21 = vld [vmem:[%s903_s0 + $0x78] sm:$0xff]  ;;  %p675_p8 = scmp.ne.s32.totalorder %s414_s24, %s674_s25  ;;  %p680_p10 = scmp.lt.s32.totalorder %s674_s25, %s674_s25 }
  0x19   :  { %67 = vperm.xlu1 %649, %v44_v3   ;;  %61 = vperm.xlu0 %648, %v42_v4   ;;  %vm302_vm0 = vcmp.gt.s32.totalorder %v301_v12, 1  ;;  %v55_v22 = vld [vmem:[%s903_s0 + $0x70] sm:$0xff]  ;;  %v215_v24 = vld [vmem:[%s906_s3] sm:$0xff]  ;;  %v216_v25 = vld [vmem:[%s906_s3 + $0x8] sm:$0xff] }
  0x1a   :  { %v303_v15 = vsel %vm302_vm0, %v301_v12, 1  ;;  %v217_v26 = vld [vmem:[%s906_s3 + $0x10] sm:$0xff]  ;;  %v592_v28 = vpack.c.bf16 %v216_v25, %v215_v24  ;;  %v218_v29 = vld [vmem:[%s906_s3 + $0x18] sm:$0xff]  ;;  %v219_v31 = vld [vmem:[%s906_s3 + $0x20] sm:$0xff]  ;;  %p681_p11 = por %p680_p10, %p679_p9 }
  0x1b   :  { %v304_v18 = vcvt.s32.f32 %v303_v15  ;;  %v595_v30 = vpack.c.bf16 %v218_v29, %v217_v26  ;;  %v220_v32 = vld [vmem:[%s906_s3 + $0x28] sm:$0xff]  ;;  %v221_v34 = vld [vmem:[%s906_s3 + $0x30] sm:$0xff]  ;;  %v222_v35 = vld [vmem:[%s906_s3 + $0x38] sm:$0xff] }
  0x1c   :  { %593 = vmatpush3.bf16.msra.mxu1 %v592_v28  ;;  %v598_v33 = vpack.c.bf16 %v220_v32, %v219_v31  ;;  %v601_v36 = vpack.c.bf16 %v222_v35, %v221_v34  ;;  %v223_v37 = vld [vmem:[%s906_s3 + $0x40] sm:$0xff]  ;;  %v224_v38 = vld [vmem:[%s906_s3 + $0x48] sm:$0xff]  ;;  %v225_v40 = vld [vmem:[%s906_s3 + $0x50] sm:$0xff]  ;;  %p682_p12 = pnand %p681_p11, %p675_p8 }
  0x1d   :  { %73 = vperm.xlu1 %649, %v46_v5   ;;  %70 = vperm.xlu0 %648, %v45_v6   ;;  %650 = vrcp.f32 %v304_v18  ;;  %v604_v39 = vpack.c.bf16 %v224_v38, %v223_v37  ;;  %v226_v41 = vld [vmem:[%s906_s3 + $0x58] sm:$0xff]  ;;  %v227_v43 = vld [vmem:[%s906_s3 + $0x60] sm:$0xff]  ;;  %v228_v44 = vld [vmem:[%s906_s3 + $0x68] sm:$0xff] }
  0x1e   :  { %594 = vmatprep.subr.bf16.mxu1 %v706_v27  ;;  %v607_v42 = vpack.c.bf16 %v226_v41, %v225_v40  ;;  %v610_v45 = vpack.c.bf16 %v228_v44, %v227_v43  ;;  %v229_v46 = vld [vmem:[%s906_s3 + $0x70] sm:$0xff]  ;;  %v230_v47 = vld [vmem:[%s906_s3 + $0x78] sm:$0xff]  ;;  %v313_v6 = vld [vmem:[#allocation2] sm:$0xff] }
  0x1f   :  { %v613_v48 = vpack.c.bf16 %v230_v47, %v229_v46  ;;  %v325_v24 = vld [vmem:[#allocation2 + $0x60] sm:$0xff]  ;;  %v326_v25 = vld [vmem:[#allocation2 + $0x68] sm:$0xff]  ;;  %v327_v32 = vld [vmem:[#allocation2 + $0x70] sm:$0xff] }
  0x20   :  { %596 = vmatpush3.bf16.msra.mxu1 %v595_v30  ;;  %v634_v26 = vpack.c.bf16 %v326_v25, %v325_v24 }
  0x21   :  { %79 = vperm.xlu1 %649, %v48_v10   ;;  %76 = vperm.xlu0 %648, %v47_v11   ;;  %v316_v11 = vld [vmem:[#allocation2 + $0x18] sm:$0xff] }
  0x22   :  { %597 = vmatprep.subr.bf16.mxu1 %v706_v27 }
  0x24   :  { %599 = vmatpush3.bf16.msra.mxu1 %v598_v33  ;;  %v328_v33 = vld [vmem:[#allocation2 + $0x78] sm:$0xff] }
  0x25   :  { %85 = vperm.xlu1 %649, %v50_v13   ;;  %82 = vperm.xlu0 %648, %v49_v14   ;;  %v317_v13 = vld [vmem:[#allocation2 + $0x20] sm:$0xff]  ;;  %v318_v14 = vld [vmem:[#allocation2 + $0x28] sm:$0xff]  ;;  %v637_v34 = vpack.c.bf16 %v328_v33, %v327_v32 }
  0x26   :  { %600 = vmatprep.subr.bf16.mxu1 %v706_v27  ;;  %v622_v15 = vpack.c.bf16 %v318_v14, %v317_v13 }
  0x27   :  { %v651_v23 = vpop.eup %650 }
  0x28   :  { %602 = vmatpush3.bf16.msra.mxu1 %v601_v36 }
  0x29   :  { %91 = vperm.xlu1 %649, %v52_v16   ;;  %88 = vperm.xlu0 %648, %v51_v17   ;;  %v319_v16 = vld [vmem:[#allocation2 + $0x30] sm:$0xff]  ;;  %v320_v17 = vld [vmem:[#allocation2 + $0x38] sm:$0xff] }
  0x2a   :  { %603 = vmatprep.subr.bf16.mxu1 %v706_v27  ;;  %v625_v18 = vpack.c.bf16 %v320_v17, %v319_v16 }
  0x2c   :  { %605 = vmatpush3.bf16.msra.mxu1 %v604_v39  ;;  %v457_v39 = vld [vmem:[%s908_s5] ss:$0 sm:$0xff] }
  0x2d   :  { %97 = vperm.xlu1 %649, %v54_v19   ;;  %94 = vperm.xlu0 %648, %v53_v20   ;;  %v322_v19 = vld [vmem:[#allocation2 + $0x48] sm:$0xff] }
  0x2e   :  { %606 = vmatprep.subr.bf16.mxu1 %v706_v27 }
  0x30   :  { %608 = vmatpush3.bf16.msra.mxu1 %v607_v42 }
  0x31   :  { %103 = vperm.xlu1 %649, %v56_v21   ;;  %100 = vperm.xlu0 %648, %v55_v22   ;;  %v323_v21 = vld [vmem:[#allocation2 + $0x50] sm:$0xff]  ;;  %v324_v22 = vld [vmem:[#allocation2 + $0x58] sm:$0xff] }
  0x32   :  { %609 = vmatprep.subr.bf16.mxu1 %v706_v27 }
  0x34   :  { %611 = vmatpush3.bf16.msra.mxu1 %v610_v45 }
  0x35   :  { %168 = vperm.xlu1 %649, %v162_v7   ;;  %164 = vperm.xlu0 %648, %v161_v8   ;;  %v314_v7 = vld [vmem:[#allocation2 + $0x8] sm:$0xff]  ;;  %v315_v8 = vld [vmem:[#allocation2 + $0x10] sm:$0xff] }
  0x36   :  { %612 = vmatprep.subr.bf16.mxu1 %v706_v27  ;;  %v616_v10 = vpack.c.bf16 %v314_v7, %v313_v6  ;;  %v619_v12 = vpack.c.bf16 %v316_v11, %v315_v8 }
  0x38   :  { %614 = vmatpush3.bf16.msra.mxu1 %v613_v48 }
  0x39   :  { %309 = vperm.xlu0 %648, %v651_v23   ;;  %v631_v23 = vpack.c.bf16 %v324_v22, %v323_v21 }
  0x94   :  { %v65_v50 = vpop.permute.xlu1 %64  ;;  %v59_v51 = vpop.permute.xlu0 %58 }
  0x95   :  { %vm105_vm3 = vcmp.eq.s32.totalorder %v59_v51, %v40_v52  ;;  %vm107_vm6 = vcmp.eq.s32.totalorder %v65_v50, %v40_v52 }
  0x98   :  { %v68_v53 = vpop.permute.xlu1 %67  ;;  %v62_v54 = vpop.permute.xlu0 %61 }
  0x99   :  { %vm106_vm2 = vcmp.eq.s32.totalorder %v62_v54, %v40_v52  ;;  %vm108_vm5 = vcmp.eq.s32.totalorder %v68_v53, %v40_v52 }
  0x9a   :  { %vm439_vm4 = vmpackc.low %vm106_vm2, %vm105_vm3 }
  0x9b   :  { %502 = vmatpush3.bf16.msk.msra.mxu0 %vm439_vm4, %v707_v55  ;;  %vm441_vm7 = vmpackc.low %vm108_vm5, %vm107_vm6 }
  0x9c   :  { %v74_v56 = vpop.permute.xlu1 %73  ;;  %v71_v57 = vpop.permute.xlu0 %70  ;;  %503 = vmatprep.subr.bf16.mxu0 %v704_v9 }
  0x9d   :  { %vm110_vm8 = vcmp.eq.s32.totalorder %v74_v56, %v40_v52  ;;  %vm109_vm9 = vcmp.eq.s32.totalorder %v71_v57, %v40_v52 }
  0x9e   :  { %vm443_vm10 = vmpackc.low %vm110_vm8, %vm109_vm9 }
  0x9f   :  { %504 = vmatpush3.bf16.msk.msra.mxu0 %vm441_vm7, %v707_v55 }
  0xa0   :  { %v80_v58 = vpop.permute.xlu1 %79  ;;  %v77_v59 = vpop.permute.xlu0 %76  ;;  %505 = vmatprep.subr.bf16.mxu0 %v704_v9 }
  0xa1   :  { %vm112_vm11 = vcmp.eq.s32.totalorder %v80_v58, %v40_v52  ;;  %vm111_vm12 = vcmp.eq.s32.totalorder %v77_v59, %v40_v52 }
  0xa2   :  { %vm445_vm13 = vmpackc.low %vm112_vm11, %vm111_vm12 }
  0xa3   :  { %506 = vmatpush3.bf16.msk.msra.mxu0 %vm443_vm10, %v707_v55 }
  0xa4   :  { %v86_v60 = vpop.permute.xlu1 %85  ;;  %v83_v61 = vpop.permute.xlu0 %82  ;;  %507 = vmatprep.subr.bf16.mxu0 %v704_v9 }
  0xa5   :  { %vm114_vm14 = vcmp.eq.s32.totalorder %v86_v60, %v40_v52  ;;  %vm113_vm15 = vcmp.eq.s32.totalorder %v83_v61, %v40_v52 }
  0xa6   :  { %vm447_vm0 = vmpackc.low %vm114_vm14, %vm113_vm15 }
  0xa7   :  { %508 = vmatpush3.bf16.msk.msra.mxu0 %vm445_vm13, %v707_v55 }
  0xa8   :  { %v92_v62 = vpop.permute.xlu1 %91  ;;  %v89_v63 = vpop.permute.xlu0 %88  ;;  %509 = vmatprep.subr.bf16.mxu0 %v704_v9 }
  0xa9   :  { %vm116_vm2 = vcmp.eq.s32.totalorder %v92_v62, %v40_v52  ;;  %vm115_vm3 = vcmp.eq.s32.totalorder %v89_v63, %v40_v52 }
  0xaa   :  { %vm449_vm4 = vmpackc.low %vm116_vm2, %vm115_vm3 }
  0xab   :  { %510 = vmatpush3.bf16.msk.msra.mxu0 %vm447_vm0, %v707_v55 }
  0xac   :  { %v98_v0 = vpop.permute.xlu1 %97  ;;  %v95_v1 = vpop.permute.xlu0 %94  ;;  %511 = vmatprep.subr.bf16.mxu0 %v704_v9 }
  0xad   :  { %vm118_vm5 = vcmp.eq.s32.totalorder %v98_v0, %v40_v52  ;;  %vm117_vm6 = vcmp.eq.s32.totalorder %v95_v1, %v40_v52 }
  0xae   :  { %vm451_vm7 = vmpackc.low %vm118_vm5, %vm117_vm6 }
  0xaf   :  { %512 = vmatpush3.bf16.msk.msra.mxu0 %vm449_vm4, %v707_v55 }
  0xb0   :  { %v104_v2 = vpop.permute.xlu1 %103  ;;  %v101_v3 = vpop.permute.xlu0 %100  ;;  %513 = vmatprep.subr.bf16.mxu0 %v704_v9 }
  0xb1   :  { %vm120_vm8 = vcmp.eq.s32.totalorder %v104_v2, %v40_v52  ;;  %vm119_vm9 = vcmp.eq.s32.totalorder %v101_v3, %v40_v52 }
  0xb2   :  { %vm453_vm12 = vmpackc.low %vm120_vm8, %vm119_vm9 }
  0xb3   :  { %514 = vmatpush3.bf16.msk.msra.mxu0 %vm451_vm7, %v707_v55 }
  0xb4   :  { %v169_v4 = vpop.permute.xlu1 %168  ;;  %v165_v5 = vpop.permute.xlu0 %164  ;;  %515 = vmatprep.subr.bf16.mxu0 %v704_v9 }
  0xb5   :  { %vm170_vm10 = vcmp.lt.s32.totalorder %v40_v52, %v169_v4  ;;  %vm166_vm11 = vcmp.ge.s32.totalorder %v40_v52, %v165_v5 }
  0xb6   :  { %vm171_vm13 = vmand %vm166_vm11, %vm170_vm10 }
  0xb7   :  { %516 = vmatpush3.bf16.msk.msra.mxu0 %vm453_vm12, %v707_v55  ;;  %vm455_vm14 = vmpackc.low %vm171_vm13, %vm171_vm13 }
  0xb8   :  { %615 = vmatprep.subr.bf16.mxu0 %v706_v27  ;;  %v310_v35 = vpop.permute.xlu0 %309 }
  0xba   :  { %518 = vmatmul.mubr.msk.bf16.vlgmr.msra.gmra.mrb[0].mxu0 %vm455_vm14, %v707_v55 }
  0xbb   :  { %588 = vmatprep.mubr.msk.f32.mxu0 %vm705_vm1, %v704_v9  ;;  %617 = vmatpush3.bf16.msra.mxu0 %v616_v10  ;;  %v321_v9 = vld [vmem:[#allocation2 + $0x40] sm:$0xff] }
  0xbc   :  { %618 = vmatprep.subr.bf16.mxu0 %v706_v27  ;;  %v628_v20 = vpack.c.bf16 %v322_v19, %v321_v9 }
  0xbf   :  { %620 = vmatpush3.bf16.msra.mxu0 %v619_v12 }
  0xc0   :  { %621 = vmatprep.subr.bf16.mxu0 %v706_v27 }
  0xc3   :  { %623 = vmatpush3.bf16.msra.mxu0 %v622_v15 }
  0xc4   :  { %624 = vmatprep.subr.bf16.mxu0 %v706_v27 }
  0xc7   :  { %626 = vmatpush3.bf16.msra.mxu0 %v625_v18 }
  0xc8   :  { %627 = vmatprep.subr.bf16.mxu0 %v706_v27 }
  0xcb   :  { %629 = vmatpush3.bf16.msra.mxu0 %v628_v20 }
  0xcc   :  { %630 = vmatprep.subr.bf16.mxu0 %v706_v27 }
  0xcf   :  { %632 = vmatpush3.bf16.msra.mxu0 %v631_v23 }
  0xd0   :  { %633 = vmatprep.subr.bf16.mxu0 %v706_v27 }
  0xd3   :  { %635 = vmatpush3.bf16.msra.mxu0 %v634_v26 }
  0xd4   :  { %636 = vmatprep.subr.bf16.mxu0 %v706_v27 }
  0xd7   :  { %638 = vmatpush3.bf16.msra.mxu0 %v637_v34 }
 0x18d   :  { %v209_v28 = vpop.f32.mrb[0].mxu0 }
 0x18e   :  { %v519_v29 = vpop.f32.mrb[1].mxu0  ;;  %554 = vmatmul.mubr.f32.vlgmr.msra.gmra.mrb[0].mxu1 %v209_v28 }
 0x18f   :  { %v212_v30 = vpop.f32.mrb[2].mxu0 }
 0x190   :  { %v520_v31 = vpop.f32.mrb[3].mxu0 }
 0x261   :  { %v297_v36 = vpop.f32.mrb[0].mxu1 }
 0x262   :  { %v312_v37 = vmul.f32 %v310_v35, %v297_v36  ;;  %v555_v38 = vpop.f32.mrb[1].mxu1 }
 0x264   :  { %589 = vmatmul.mubr.f32.vlgmr.msra.gmra.mrb[4].mxu0 %v312_v37 }
 0x337   :  { %v402_v27 = vpop.f32.mrb[4].mxu0 }
 0x338   :  { %v403_v40 = vadd.f32 %v457_v39, %v402_v27  ;;  %v590_v41 = vpop.f32.mrb[5].mxu0 }
 0x33a   :  { %406 = vst [vmem:[#allocation5] sm:$0xff] %v403_v40 }
 0x33b   :  { %685 = shalt.err (!%p682_p12)
}
 0x33c   :  { %s686_s28 = scalar_lea.hbm %s909_s6, 128 }
 0x33d   :  { %p687_p13 = scmp.ne.s32.totalorder %s909_s6, %s686_s28  ;;  %p690_p0 = scmp.lt.u32.totalorder %s686_s28, %s909_s6 }
 0x33f   :  { %p692_p1 = pnand %p690_p0, %p687_p13 }
 0x341   :  { %695 = shalt.err (!%p692_p1)
}
 0x342   :  { %416 = dma.vmem_to_hbm [thread:$0]  %s414_s24, 128, %s909_s6, [#allocation4]  }
 0x343   :  { %698 = dma.done.wait [#allocation4], 128  }
 0x344   :  { %699 = vsyncadd [#allocation4], 4294967168 }
 0x345   :  { %420 = vsyncpa [#allocation3], 1 }
 0x346   :  { %421 = vsyncpa [#allocation4], 1 }

</bundles_post_ra>
